<compile_context>
chip_gen: v7x
topology: tpu7x:2x2x1
jax: 0.10.0
libtpu: 0.0.40
codegen_flags: <defaults>
</compile_context>

<pallas_src>
import jax
import jax.numpy as jnp
from jax.experimental import pallas as pl
from jax.experimental.pallas import tpu as pltpu


def _round_up(n, m):
    return ((n + m - 1) // m) * m


# ---------------------------------------------------------------------------
# Pallas kernel: fused Linear -> ReLU -> Linear -> ReLU -> Linear
# ---------------------------------------------------------------------------
def _sn_disc_kernel(x_ref, w1_ref, b1_ref, w2_ref, b2_ref, w3_ref, b3_ref, y_ref):
    # x: (TB, in_f) f32/bf16  w1: (in_f, H) bf16  w2: (H, H) bf16
    # b1/b2/w3: (1, H) f32    b3: (1, 1) f32 in SMEM   y: (1, 1, TB) f32
    # Cast x in-register (no wrapper-side HBM cast pass over x).
    x = x_ref[...].astype(jnp.bfloat16)

    h1 = jnp.dot(x, w1_ref[...], preferred_element_type=jnp.float32) + b1_ref[...]
    h1 = jnp.maximum(h1, 0.0)                                   # relu1 (f32, VPU)

    h2 = jnp.dot(h1.astype(jnp.bfloat16), w2_ref[...],
                 preferred_element_type=jnp.float32) + b2_ref[...]
    h2 = jnp.maximum(h2, 0.0)                                   # relu2 (f32, VPU)

    # Final (H -> 1) layer, produced lane-dense: y_row[0, t] = sum_h w3[0,h]*h2[t,h].
    # This is an "NT" contraction (both last dims), same pattern as attention QK^T,
    # so the per-row scalars land along lanes and the store is a dense (1, TB) row.
    y_row = jax.lax.dot_general(
        w3_ref[...], h2,
        dimension_numbers=(((1,), (1,)), ((), ())),
        preferred_element_type=jnp.float32) + b3_ref[0, 0]      # (1, TB)

    # NOTE: rows >= B of the last (padded) tile contain garbage derived from
    # padded x reads; they are sliced off in the wrapper.  Never reduce over the
    # batch dimension inside this kernel.
    y_ref[...] = y_row[None].astype(y_ref.dtype)                # (1, 1, TB)


# ---------------------------------------------------------------------------
# Wrapper
# ---------------------------------------------------------------------------
def _vmem_budget_bytes(TB, in_f, H):
    lane, sub = 128, 8
    Hp, inp = _round_up(H, lane), _round_up(in_f, lane)
    weights = _round_up(in_f, sub) * Hp * 2 + Hp * Hp * 2 + 3 * sub * Hp * 4
    io = 2 * TB * inp * 4 + 2 * sub * TB * 4       # double-buffered x block + out rows
    tmp = TB * inp * 2 + 2 * TB * Hp * 4           # bf16 x copy + f32 h1/h2
    need = weights + io + tmp
    return int(min(100 << 20, max(8 << 20, 2 * need)))          # 2x headroom, 8 MiB floor


def _build_call(x, params, TB, n_tiles, single_buffer_weights, vmem_limit):
    in_f = x.shape[1]
    H = params["w1"].shape[1]

    # Constant index_map -> weights/biases stay VMEM-resident across grid steps.
    # Single-buffer them (Buffered(1)) so they do not pay double-buffer VMEM.
    wkw = {"pipeline_mode": pl.Buffered(1)} if single_buffer_weights else {}
    const2 = lambda i: (0, 0)

    in_specs = [
        pl.BlockSpec((TB, in_f), lambda i: (i, 0)),             # x: tiled over batch
        pl.BlockSpec((in_f, H), const2, **wkw),                 # w1
        pl.BlockSpec((1, H), const2, **wkw),                    # b1
        pl.BlockSpec((H, H), const2, **wkw),                    # w2
        pl.BlockSpec((1, H), const2, **wkw),                    # b2
        pl.BlockSpec((1, H), const2, **wkw),                    # w3 row
        pl.BlockSpec((1, 1), const2,
                     memory_space=pltpu.MemorySpace.SMEM),      # b3 scalar in SMEM
    ]
    # Lane-dense output: one (1, TB) row per batch tile.
    out_specs = pl.BlockSpec((1, 1, TB), lambda i: (i, 0, 0))

    return pl.pallas_call(
        _sn_disc_kernel,
        out_shape=jax.ShapeDtypeStruct((n_tiles, 1, TB), jnp.float32),
        grid=(n_tiles,),
        in_specs=in_specs,
        out_specs=out_specs,
        compiler_params=pltpu.CompilerParams(
            dimension_semantics=("parallel",),
            vmem_limit_bytes=vmem_limit,
        ),
    )(x, params["w1"], params["b1"], params["w2"], params["b2"],
      params["w3"], params["b3"])


def sn_discriminator_forward(x, params):
    """x: (B, in_feature) float32 (or bf16). params from make_params(). Returns (B, 1) f32."""
    B, in_f = x.shape
    H = params["w1"].shape[1]

    # Batch tile: multiple of 16 (bf16 sublane packing).  Cap at 2048 (keeps the
    # f32 h1/h2 intermediates friendly to v5e's single store slot while still
    # amortizing the ~0.35 us per-grid-step overhead).  For large B, split into
    # >= 2 tiles so both v7x TensorCores get work.
    B16 = _round_up(B, 16)
    TB = min(B16, 2048)
    if B16 >= 512:
        TB = min(TB, _round_up(pl.cdiv(B16, 2), 16))
    # Shrink if the double-buffered x tile alone would blow a conservative budget
    # (only triggers for very wide in_feature).
    while TB > 256 and 2 * TB * _round_up(in_f, 128) * 4 > (8 << 20):
        TB = max(256, _round_up(TB // 2, 16))

    n_tiles = pl.cdiv(B, TB)
    vmem_limit = _vmem_budget_bytes(TB, in_f, H)

    try:
        y = _build_call(x, params, TB, n_tiles, True, vmem_limit)
    except Exception:
        # BlockSpec.pipeline_mode / Buffered(1) unavailable: fall back to default
        # double-buffered weight blocks (constant index_map still means each
        # weight is DMA'd only once).
        y = _build_call(x, params, TB, n_tiles, False, vmem_limit)

    # Drop padded tail rows (they were computed from padded/undefined x reads)
    # and restore the (B, 1) shape of the PyTorch module.
    return y.reshape(n_tiles * TB)[:B].reshape(B, 1)


# ---------------------------------------------------------------------------
# Deterministic parameter setup (plain JAX glue; matches init_weights + SNLinear)
# ---------------------------------------------------------------------------
def _xavier_normal(key, out_f, in_f):
    std = jnp.sqrt(2.0 / (in_f + out_f))
    return jax.random.normal(key, (out_f, in_f), dtype=jnp.float32) * std


def _spectral_normalize(w, n_iter=5, eps=1e-12):
    # Power iteration: W_sn = W / sigma_max(W).  PyTorch's spectral_norm does one
    # iteration per forward with a persistent u buffer, so this matches only to a
    # tolerance, not exactly.
    u = jnp.ones((w.shape[0],), jnp.float32) / jnp.sqrt(jnp.float32(w.shape[0]))

    def body(_, u):
        v = w.T @ u
        v = v / (jnp.linalg.norm(v) + eps)
        u = w @ v
        u = u / (jnp.linalg.norm(u) + eps)
        return u

    u = jax.lax.fori_loop(0, n_iter, body, u)
    v = w.T @ u
    v = v / (jnp.linalg.norm(v) + eps)
    sigma = u @ (w @ v)
    return w / sigma


def make_params(key, in_feature, hidden_size):
    k1, k2, k3 = jax.random.split(key, 3)
    w1 = _spectral_normalize(_xavier_normal(k1, hidden_size, in_feature))
    w2 = _spectral_normalize(_xavier_normal(k2, hidden_size, hidden_size))
    w3 = _spectral_normalize(_xavier_normal(k3, 1, hidden_size))
    return {
        # W1/W2 stored transposed (in, out) and pre-cast to bf16 for the MXU
        # (one-time setup cost, not a per-forward HBM pass); biases and the
        # (1, H) w3 row kept in f32.  bf16 weights are an intentional precision
        # change vs. the f32 PyTorch module (validated below to a tolerance).
        "w1": w1.T.astype(jnp.bfloat16),
        "b1": jnp.zeros((1, hidden_size), jnp.float32),
        "w2": w2.T.astype(jnp.bfloat16),
        "b2": jnp.zeros((1, hidden_size), jnp.float32),
        "w3": w3.astype(jnp.float32),                    # (1, hidden_size) row
        "b3": jnp.zeros((1, 1), jnp.float32),
    }


# ---------------------------------------------------------------------------
if __name__ == "__main__":
    B, in_feature, hidden_size = 16, 16, 32

    key = jax.random.PRNGKey(0)
    kx, kp = jax.random.split(key)
    x = jax.random.normal(kx, (B, in_feature), dtype=jnp.float32)
    params = make_params(kp, in_feature, hidden_size)

    y = sn_discriminator_forward(x, params)
    jax.block_until_ready(y)
    assert y.shape == (B, 1), y.shape

    # Reference 1: identical bf16/f32 pipeline (tight tolerance — checks the kernel).
    def ref_same_precision(xf, p):
        xb = xf.astype(jnp.bfloat16)
        h1 = jnp.maximum(
            jnp.dot(xb, p["w1"], preferred_element_type=jnp.float32) + p["b1"], 0.0)
        h2 = jnp.maximum(
            jnp.dot(h1.astype(jnp.bfloat16), p["w2"],
                    preferred_element_type=jnp.float32) + p["b2"], 0.0)
        return jnp.sum(h2 * p["w3"], axis=-1, keepdims=True) + p["b3"]

    y_ref = ref_same_precision(x, params)
    assert jnp.allclose(y, y_ref, atol=2e-2, rtol=2e-2), (y, y_ref)

    # Reference 2: full-f32 math (loose tolerance — documents the bf16 precision
    # drift vs. the f32 PyTorch SNDiscriminator as a tolerance, not exactness).
    def ref_f32(xf, p):
        w1 = p["w1"].astype(jnp.float32)
        w2 = p["w2"].astype(jnp.float32)
        h1 = jnp.maximum(xf @ w1 + p["b1"], 0.0)
        h2 = jnp.maximum(h1 @ w2 + p["b2"], 0.0)
        return jnp.sum(h2 * p["w3"], axis=-1, keepdims=True) + p["b3"]

    y_f32 = ref_f32(x, params)
    assert jnp.allclose(y, y_f32, atol=1e-1, rtol=1e-1), (y, y_f32)

    print("KERNEL_OK")
</pallas_src>

<mosaic_0001>
module attributes {stable_mosaic.version = 11 : i64} {
  func.func @_sn_disc_kernel(%arg0: i32, %arg1: memref<16x16xf32, #tpu.memory_space<vmem>>, %arg2: memref<16x32xbf16, #tpu.memory_space<vmem>>, %arg3: memref<1x32xf32, #tpu.memory_space<vmem>>, %arg4: memref<32x32xbf16, #tpu.memory_space<vmem>>, %arg5: memref<1x32xf32, #tpu.memory_space<vmem>>, %arg6: memref<1x32xf32, #tpu.memory_space<vmem>>, %arg7: memref<1x1xf32, #tpu.memory_space<smem>>, %arg8: memref<1x1x16xf32, #tpu.memory_space<vmem>>) attributes {dimension_semantics = [#tpu.dimension_semantics<parallel>], iteration_bounds = array<i64: 1>, scalar_prefetch = 0 : i64, scratch_operands = 0 : i64, tpu.core_type = #tpu.core_type<tc>, window_params = [{transform_indices = @transform_0, window_bounds = array<i64: 16, 16>}, {pipeline_mode = #tpu.pipeline_mode<synchronous>, transform_indices = @transform_1, window_bounds = array<i64: 16, 32>}, {pipeline_mode = #tpu.pipeline_mode<synchronous>, transform_indices = @transform_2, window_bounds = array<i64: 1, 32>}, {pipeline_mode = #tpu.pipeline_mode<synchronous>, transform_indices = @transform_3, window_bounds = array<i64: 32, 32>}, {pipeline_mode = #tpu.pipeline_mode<synchronous>, transform_indices = @transform_4, window_bounds = array<i64: 1, 32>}, {pipeline_mode = #tpu.pipeline_mode<synchronous>, transform_indices = @transform_5, window_bounds = array<i64: 1, 32>}, {transform_indices = @transform_6, window_bounds = array<i64: 1, 1>}, {transform_indices = @transform_7, window_bounds = array<i64: 1, 1, 16>}]} {
    %c0 = arith.constant 0 : index
    %c0_0 = arith.constant 0 : index
    %0 = vector.load %arg1[%c0, %c0_0] : memref<16x16xf32, #tpu.memory_space<vmem>>, vector<16x16xf32>
    %1 = arith.truncf %0 : vector<16x16xf32> to vector<16x16xbf16>
    %c0_1 = arith.constant 0 : index
    %c0_2 = arith.constant 0 : index
    %2 = vector.load %arg2[%c0_1, %c0_2] : memref<16x32xbf16, #tpu.memory_space<vmem>>, vector<16x32xbf16>
    %cst = arith.constant dense<0.000000e+00> : vector<16x32xf32>
    %3 = tpu.matmul %1, %2, %cst {dimension_numbers = #tpu.dot_dimension_numbers<[1], [0], [0], [1], [0, 0, 1, 1], [], []>} : vector<16x16xbf16>, vector<16x32xbf16>, vector<16x32xf32> -> vector<16x32xf32>
    %c0_3 = arith.constant 0 : index
    %c0_4 = arith.constant 0 : index
    %4 = vector.load %arg3[%c0_3, %c0_4] : memref<1x32xf32, #tpu.memory_space<vmem>>, vector<1x32xf32>
    %5 = vector.broadcast %4 : vector<1x32xf32> to vector<16x32xf32>
    %6 = arith.addf %3, %5 : vector<16x32xf32>
    %cst_5 = arith.constant 0.000000e+00 : f32
    %7 = vector.broadcast %cst_5 : f32 to vector<16x32xf32>
    %8 = arith.maximumf %6, %7 : vector<16x32xf32>
    %9 = arith.truncf %8 : vector<16x32xf32> to vector<16x32xbf16>
    %c0_6 = arith.constant 0 : index
    %c0_7 = arith.constant 0 : index
    %10 = vector.load %arg4[%c0_6, %c0_7] : memref<32x32xbf16, #tpu.memory_space<vmem>>, vector<32x32xbf16>
    %cst_8 = arith.constant dense<0.000000e+00> : vector<16x32xf32>
    %11 = tpu.matmul %9, %10, %cst_8 {dimension_numbers = #tpu.dot_dimension_numbers<[1], [0], [0], [1], [0, 0, 1, 1], [], []>} : vector<16x32xbf16>, vector<32x32xbf16>, vector<16x32xf32> -> vector<16x32xf32>
    %c0_9 = arith.constant 0 : index
    %c0_10 = arith.constant 0 : index
    %12 = vector.load %arg5[%c0_9, %c0_10] : memref<1x32xf32, #tpu.memory_space<vmem>>, vector<1x32xf32>
    %13 = vector.broadcast %12 : vector<1x32xf32> to vector<16x32xf32>
    %14 = arith.addf %11, %13 : vector<16x32xf32>
    %cst_11 = arith.constant 0.000000e+00 : f32
    %15 = vector.broadcast %cst_11 : f32 to vector<16x32xf32>
    %16 = arith.maximumf %14, %15 : vector<16x32xf32>
    %c0_12 = arith.constant 0 : index
    %c0_13 = arith.constant 0 : index
    %17 = vector.load %arg6[%c0_12, %c0_13] : memref<1x32xf32, #tpu.memory_space<vmem>>, vector<1x32xf32>
    %cst_14 = arith.constant dense<0.000000e+00> : vector<1x16xf32>
    %18 = tpu.matmul %17, %16, %cst_14 {dimension_numbers = #tpu.dot_dimension_numbers<[1], [1], [0], [0], [0, 0, 1, 0], [], []>} : vector<1x32xf32>, vector<16x32xf32>, vector<1x16xf32> -> vector<1x16xf32>
    %c0_15 = arith.constant 0 : index
    %c0_16 = arith.constant 0 : index
    %19 = memref.load %arg7[%c0_15, %c0_16] : memref<1x1xf32, #tpu.memory_space<smem>>
    %20 = vector.broadcast %19 : f32 to vector<1x16xf32>
    %21 = arith.addf %18, %20 : vector<1x16xf32>
    %22 = vector.shape_cast %21 : vector<1x16xf32> to vector<1x1x16xf32>
    %c0_17 = arith.constant 0 : index
    %c0_18 = arith.constant 0 : index
    %c0_19 = arith.constant 0 : index
    %23 = vector.load %arg8[%c0_17, %c0_18, %c0_19] : memref<1x1x16xf32, #tpu.memory_space<vmem>>, vector<1x1x16xf32>
    tpu.vector_store %arg8[%c0_17, %c0_18, %c0_19], %22 {strides = array<i32>} : memref<1x1x16xf32, #tpu.memory_space<vmem>>, vector<1x1x16xf32>,
    return
  }
  func.func @transform_0(%arg0: i32) -> (i32, i32) {
    %c0_i32 = arith.constant 0 : i32
    %c0_i32_0 = arith.constant 0 : i32
    return %arg0, %c0_i32 : i32, i32
  }
  func.func @transform_1(%arg0: i32) -> (i32, i32) {
    %c0_i32 = arith.constant 0 : i32
    %c0_i32_0 = arith.constant 0 : i32
    %c0_i32_1 = arith.constant 0 : i32
    return %c0_i32, %c0_i32_0 : i32, i32
  }
  func.func @transform_2(%arg0: i32) -> (i32, i32) {
    %c0_i32 = arith.constant 0 : i32
    %c0_i32_0 = arith.constant 0 : i32
    %c0_i32_1 = arith.constant 0 : i32
    return %c0_i32, %c0_i32_0 : i32, i32
  }
  func.func @transform_3(%arg0: i32) -> (i32, i32) {
    %c0_i32 = arith.constant 0 : i32
    %c0_i32_0 = arith.constant 0 : i32
    %c0_i32_1 = arith.constant 0 : i32
    return %c0_i32, %c0_i32_0 : i32, i32
  }
  func.func @transform_4(%arg0: i32) -> (i32, i32) {
    %c0_i32 = arith.constant 0 : i32
    %c0_i32_0 = arith.constant 0 : i32
    %c0_i32_1 = arith.constant 0 : i32
    return %c0_i32, %c0_i32_0 : i32, i32
  }
  func.func @transform_5(%arg0: i32) -> (i32, i32) {
    %c0_i32 = arith.constant 0 : i32
    %c0_i32_0 = arith.constant 0 : i32
    %c0_i32_1 = arith.constant 0 : i32
    return %c0_i32, %c0_i32_0 : i32, i32
  }
  func.func @transform_6(%arg0: i32) -> (i32, i32) {
    %c0_i32 = arith.constant 0 : i32
    %c0_i32_0 = arith.constant 0 : i32
    %c0_i32_1 = arith.constant 0 : i32
    return %c0_i32, %c0_i32_0 : i32, i32
  }
  func.func @transform_7(%arg0: i32) -> (i32, i32, i32) {
    %c0_i32 = arith.constant 0 : i32
    %c0_i32_0 = arith.constant 0 : i32
    %c0_i32_1 = arith.constant 0 : i32
    return %arg0, %c0_i32, %c0_i32_0 : i32, i32, i32
  }
}

module attributes {stable_mosaic.version = 11 : i64} {
  func.func @_sn_disc_kernel(%arg0: i32, %arg1: memref<16x16xf32, #tpu.memory_space<vmem>>, %arg2: memref<16x32xbf16, #tpu.memory_space<vmem>>, %arg3: memref<1x32xf32, #tpu.memory_space<vmem>>, %arg4: memref<32x32xbf16, #tpu.memory_space<vmem>>, %arg5: memref<1x32xf32, #tpu.memory_space<vmem>>, %arg6: memref<1x32xf32, #tpu.memory_space<vmem>>, %arg7: memref<1x1xf32, #tpu.memory_space<smem>>, %arg8: memref<1x1x16xf32, #tpu.memory_space<vmem>>) attributes {dimension_semantics = [#tpu.dimension_semantics<parallel>], iteration_bounds = array<i64: 1>, scalar_prefetch = 0 : i64, scratch_operands = 0 : i64, tpu.core_type = #tpu.core_type<tc>, window_params = [{transform_indices = @transform_0, window_bounds = array<i64: 16, 16>}, {pipeline_mode = #tpu.pipeline_mode<synchronous>, transform_indices = @transform_1, window_bounds = array<i64: 16, 32>}, {pipeline_mode = #tpu.pipeline_mode<synchronous>, transform_indices = @transform_2, window_bounds = array<i64: 1, 32>}, {pipeline_mode = #tpu.pipeline_mode<synchronous>, transform_indices = @transform_3, window_bounds = array<i64: 32, 32>}, {pipeline_mode = #tpu.pipeline_mode<synchronous>, transform_indices = @transform_4, window_bounds = array<i64: 1, 32>}, {pipeline_mode = #tpu.pipeline_mode<synchronous>, transform_indices = @transform_5, window_bounds = array<i64: 1, 32>}, {transform_indices = @transform_6, window_bounds = array<i64: 1, 1>}, {transform_indices = @transform_7, window_bounds = array<i64: 1, 1, 16>}]} {
    %c0 = arith.constant 0 : index
    %c0_0 = arith.constant 0 : index
    %0 = vector.load %arg1[%c0, %c0_0] : memref<16x16xf32, #tpu.memory_space<vmem>>, vector<16x16xf32>
    %1 = arith.truncf %0 : vector<16x16xf32> to vector<16x16xbf16>
    %c0_1 = arith.constant 0 : index
    %c0_2 = arith.constant 0 : index
    %2 = vector.load %arg2[%c0_1, %c0_2] : memref<16x32xbf16, #tpu.memory_space<vmem>>, vector<16x32xbf16>
    %cst = arith.constant dense<0.000000e+00> : vector<16x32xf32>
    %3 = tpu.matmul %1, %2, %cst {dimension_numbers = #tpu.dot_dimension_numbers<[1], [0], [0], [1], [0, 0, 1, 1], [], []>} : vector<16x16xbf16>, vector<16x32xbf16>, vector<16x32xf32> -> vector<16x32xf32>
    %c0_3 = arith.constant 0 : index
    %c0_4 = arith.constant 0 : index
    %4 = vector.load %arg3[%c0_3, %c0_4] : memref<1x32xf32, #tpu.memory_space<vmem>>, vector<1x32xf32>
    %5 = vector.broadcast %4 : vector<1x32xf32> to vector<16x32xf32>
    %6 = arith.addf %3, %5 : vector<16x32xf32>
    %cst_5 = arith.constant 0.000000e+00 : f32
    %7 = vector.broadcast %cst_5 : f32 to vector<16x32xf32>
    %8 = arith.maximumf %6, %7 : vector<16x32xf32>
    %9 = arith.truncf %8 : vector<16x32xf32> to vector<16x32xbf16>
    %c0_6 = arith.constant 0 : index
    %c0_7 = arith.constant 0 : index
    %10 = vector.load %arg4[%c0_6, %c0_7] : memref<32x32xbf16, #tpu.memory_space<vmem>>, vector<32x32xbf16>
    %cst_8 = arith.constant dense<0.000000e+00> : vector<16x32xf32>
    %11 = tpu.matmul %9, %10, %cst_8 {dimension_numbers = #tpu.dot_dimension_numbers<[1], [0], [0], [1], [0, 0, 1, 1], [], []>} : vector<16x32xbf16>, vector<32x32xbf16>, vector<16x32xf32> -> vector<16x32xf32>
    %c0_9 = arith.constant 0 : index
    %c0_10 = arith.constant 0 : index
    %12 = vector.load %arg5[%c0_9, %c0_10] : memref<1x32xf32, #tpu.memory_space<vmem>>, vector<1x32xf32>
    %13 = vector.broadcast %12 : vector<1x32xf32> to vector<16x32xf32>
    %14 = arith.addf %11, %13 : vector<16x32xf32>
    %cst_11 = arith.constant 0.000000e+00 : f32
    %15 = vector.broadcast %cst_11 : f32 to vector<16x32xf32>
    %16 = arith.maximumf %14, %15 : vector<16x32xf32>
    %c0_12 = arith.constant 0 : index
    %c0_13 = arith.constant 0 : index
    %17 = vector.load %arg6[%c0_12, %c0_13] : memref<1x32xf32, #tpu.memory_space<vmem>>, vector<1x32xf32>
    %cst_14 = arith.constant dense<0.000000e+00> : vector<1x16xf32>
    %18 = tpu.matmul %17, %16, %cst_14 {dimension_numbers = #tpu.dot_dimension_numbers<[1], [1], [0], [0], [0, 0, 1, 0], [], []>} : vector<1x32xf32>, vector<16x32xf32>, vector<1x16xf32> -> vector<1x16xf32>
    %c0_15 = arith.constant 0 : index
    %c0_16 = arith.constant 0 : index
    %19 = memref.load %arg7[%c0_15, %c0_16] : memref<1x1xf32, #tpu.memory_space<smem>>
    %20 = vector.broadcast %19 : f32 to vector<1x16xf32>
    %21 = arith.addf %18, %20 : vector<1x16xf32>
    %22 = vector.shape_cast %21 : vector<1x16xf32> to vector<1x1x16xf32>
    %c0_17 = arith.constant 0 : index
    %c0_18 = arith.constant 0 : index
    %c0_19 = arith.constant 0 : index
    %23 = vector.load %arg8[%c0_17, %c0_18, %c0_19] : memref<1x1x16xf32, #tpu.memory_space<vmem>>, vector<1x1x16xf32>
    tpu.vector_store %arg8[%c0_17, %c0_18, %c0_19], %22 {strides = array<i32>} : memref<1x1x16xf32, #tpu.memory_space<vmem>>, vector<1x1x16xf32>,
    return
  }
  func.func @transform_0(%arg0: i32) -> (i32, i32) {
    %c0_i32 = arith.constant 0 : i32
    %c0_i32_0 = arith.constant 0 : i32
    return %arg0, %c0_i32 : i32, i32
  }
  func.func @transform_1(%arg0: i32) -> (i32, i32) {
    %c0_i32 = arith.constant 0 : i32
    %c0_i32_0 = arith.constant 0 : i32
    %c0_i32_1 = arith.constant 0 : i32
    return %c0_i32, %c0_i32_0 : i32, i32
  }
  func.func @transform_2(%arg0: i32) -> (i32, i32) {
    %c0_i32 = arith.constant 0 : i32
    %c0_i32_0 = arith.constant 0 : i32
    %c0_i32_1 = arith.constant 0 : i32
    return %c0_i32, %c0_i32_0 : i32, i32
  }
  func.func @transform_3(%arg0: i32) -> (i32, i32) {
    %c0_i32 = arith.constant 0 : i32
    %c0_i32_0 = arith.constant 0 : i32
    %c0_i32_1 = arith.constant 0 : i32
    return %c0_i32, %c0_i32_0 : i32, i32
  }
  func.func @transform_4(%arg0: i32) -> (i32, i32) {
    %c0_i32 = arith.constant 0 : i32
    %c0_i32_0 = arith.constant 0 : i32
    %c0_i32_1 = arith.constant 0 : i32
    return %c0_i32, %c0_i32_0 : i32, i32
  }
  func.func @transform_5(%arg0: i32) -> (i32, i32) {
    %c0_i32 = arith.constant 0 : i32
    %c0_i32_0 = arith.constant 0 : i32
    %c0_i32_1 = arith.constant 0 : i32
    return %c0_i32, %c0_i32_0 : i32, i32
  }
  func.func @transform_6(%arg0: i32) -> (i32, i32) {
    %c0_i32 = arith.constant 0 : i32
    %c0_i32_0 = arith.constant 0 : i32
    %c0_i32_1 = arith.constant 0 : i32
    return %c0_i32, %c0_i32_0 : i32, i32
  }
  func.func @transform_7(%arg0: i32) -> (i32, i32, i32) {
    %c0_i32 = arith.constant 0 : i32
    %c0_i32_0 = arith.constant 0 : i32
    %c0_i32_1 = arith.constant 0 : i32
    return %arg0, %c0_i32, %c0_i32_0 : i32, i32, i32
  }
}

</mosaic_0001>

<bundles_post_ra>
// kernel: tpu_custom_call.1
= control target key start
LH: loop header
LB: loop body
LE: loop exit
PB: predicated region body
PF: predicated region fallthrough
CT: control target
= control target key end

     0   :  { %13 = vsyncpa [#allocation4], 0  ;;  %s578_s0 = inlined_call_operand.hbm [shape: f32[16,16], index: 0, kind: input, shape index: {}]   ;;  %s579_s1 = inlined_call_operand.hbm [shape: bf16[16,32], index: 1, kind: input, shape index: {}]   ;;  %s580_s2 = inlined_call_operand.vmem [shape: f32[1,32], index: 2, kind: input, shape index: {}]   ;;  %s581_s3 = inlined_call_operand.hbm [shape: bf16[32,32], index: 3, kind: input, shape index: {}]   ;;  %s582_s4 = inlined_call_operand.vmem [shape: f32[1,32], index: 4, kind: input, shape index: {}]   ;;  %s583_s5 = inlined_call_operand.vmem [shape: f32[1,32], index: 5, kind: input, shape index: {}]   ;;  %s584_s6 = inlined_call_operand.<no memory space> [shape: f32[1,1], index: 6, kind: input, shape index: {}]   ;;  %s585_s7 = inlined_call_operand.hbm [shape: f32[1,1,16], index: 7, kind: output, shape index: {}]  }
   0x1   :  { %14 = vsyncpa [#allocation7], 0 }
   0x2   :  { %15 = vsyncpa [#allocation5], 0  ;;  %s457_s24 = smov [#allocation6]   ;;  %s363_s28 = scalar_lea.hbm %s579_s1, 128 }
   0x3   :  { %s33_s25 = sshll.u32 %s457_s24, 4  ;;  %p364_p0 = scmp.ne.s32.totalorder %s579_s1, %s363_s28  ;;  %s34_s25 = int_to_ptr.vmem [resolvable:$true] %s33_s25 }
   0x4   :  { %p367_p1 = scmp.lt.u32.totalorder %s363_s28, %s579_s1 }
   0x6   :  { %p369_p2 = pnand %p367_p1, %p364_p0 }
   0x8   :  { %372 = shalt.err (!%p369_p2)
}
   0x9   :  { %s373_s10 = scalar_lea.vmem %s34_s25, 128  ;;  %p378_p4 = scmp.lt.s32.totalorder %s34_s25, %s34_s25 }
   0xa   :  { %p374_p3 = scmp.ne.s32.totalorder %s34_s25, %s373_s10  ;;  %p379_p5 = scmp.lt.s32.totalorder %s373_s10, %s373_s10 }
   0xc   :  { %p380_p6 = por %p379_p5, %p378_p4 }
   0xe   :  { %p381_p7 = pnand %p380_p6, %p374_p3 }
  0x10   :  { %384 = shalt.err (!%p381_p7)
}
  0x11   :  { %s458_s11 = smov 64   ;;  %s459_s12 = smov 4  }
  0x12   :  { %39 = dma.hbm_to_vmem [thread:$0]  %s579_s1, 128, %s34_s25, [#allocation7], %s458_s11, %s458_s11, %s459_s12  }
  0x13   :  { %s460_s15 = smov [#allocation3]   ;;  %s385_s19 = scalar_lea.hbm %s578_s0, 256 }
  0x14   :  { %s21_s16 = sshll.u32 %s460_s15, 4  ;;  %p386_p8 = scmp.ne.s32.totalorder %s578_s0, %s385_s19  ;;  %s22_s16 = int_to_ptr.vmem [resolvable:$true] %s21_s16 }
  0x15   :  { %p389_p9 = scmp.lt.u32.totalorder %s385_s19, %s578_s0 }
  0x17   :  { %p391_p10 = pnand %p389_p9, %p386_p8 }
  0x19   :  { %394 = shalt.err (!%p391_p10)
}
  0x1a   :  { %s395_s24 = scalar_lea.vmem %s22_s16, 256  ;;  %p400_p12 = scmp.lt.s32.totalorder %s22_s16, %s22_s16 }
  0x1b   :  { %p396_p11 = scmp.ne.s32.totalorder %s22_s16, %s395_s24  ;;  %p401_p13 = scmp.lt.s32.totalorder %s395_s24, %s395_s24 }
  0x1d   :  { %p402_p0 = por %p401_p13, %p400_p12 }
  0x1f   :  { %p403_p1 = pnand %p402_p0, %p396_p11 }
  0x21   :  { %406 = shalt.err (!%p403_p1)
}
  0x22   :  { %s461_s1 = smov 128   ;;  %s462_s25 = smov 8  }
  0x23   :  { %27 = dma.hbm_to_vmem [thread:$0]  %s578_s0, 256, %s22_s16, [#allocation4], %s461_s1, %s461_s1, %s462_s25  }
  0x24   :  { %s463_s28 = smov [#allocation8]   ;;  %s407_s9 = scalar_lea.hbm %s581_s3, 256 }
  0x25   :  { %s47_s29 = sshll.u32 %s463_s28, 4  ;;  %p408_p2 = scmp.ne.s32.totalorder %s581_s3, %s407_s9  ;;  %s48_s29 = int_to_ptr.vmem [resolvable:$true] %s47_s29 }
  0x26   :  { %p411_p3 = scmp.lt.u32.totalorder %s407_s9, %s581_s3 }
  0x28   :  { %p413_p4 = pnand %p411_p3, %p408_p2 }
  0x2a   :  { %416 = shalt.err (!%p413_p4)
}
  0x2b   :  { %s417_s17 = scalar_lea.vmem %s48_s29, 256  ;;  %p422_p6 = scmp.lt.s32.totalorder %s48_s29, %s48_s29 }
  0x2c   :  { %p418_p5 = scmp.ne.s32.totalorder %s48_s29, %s417_s17  ;;  %p423_p7 = scmp.lt.s32.totalorder %s417_s17, %s417_s17 }
  0x2e   :  { %p424_p8 = por %p423_p7, %p422_p6 }
  0x30   :  { %p425_p9 = pnand %p424_p8, %p418_p5 }
  0x32   :  { %428 = shalt.err (!%p425_p9)
}
  0x33   :  { %53 = dma.hbm_to_vmem [thread:$0]  %s581_s3, 256, %s48_s29, [#allocation7], %s458_s11, %s458_s11, %s459_s12  }
  0x34   :  { %451 = dma.done.wait [#allocation4], 256  }
  0x35   :  { %452 = vsyncadd [#allocation4], 4294967040 }
  0x36   :  { %453 = dma.done.wait [#allocation7], 384  }
  0x37   :  { %454 = vsyncadd [#allocation7], 4294966912  ;;  %v464_v0 = vmov 0.0   ;;  %vm465_vm0 = vmmov 0   ;;  %v360_v1 = vld [vmem:[#allocation6] sm:$0xff]   ;;  %v70_v2 = vld [vmem:[#allocation3] sm:$0xff]  ;;  %v208_v29 = vstv %s584_s6 }
  0x38   :  { %324 = vmatprep.subr.bf16.mxu0 %v464_v0  ;;  %326 = vmatprep.mubr.msk.bf16.mxu0 %vm465_vm0, %v464_v0  ;;  %v71_v3 = vld [vmem:[#allocation3 + $0x8] sm:$0xff]  ;;  %vm88_vm1 = vcmask 130048   ;;  %v361_v5 = vld [vmem:[#allocation8] sm:$0xff]   ;;  %v362_v6 = vld [vmem:[#allocation8 + $0x8] sm:$0xff]   ;;  %vm159_vm2 = vcmask 261120   ;;  %v466_v17 = vmov 0.0|0.0  }
  0x39   :  { %330 = vmatprep.subr.bf16.mxu1 %v464_v0  ;;  %334 = vmatprep.mubr.msk.bf16.mxu1 %vm465_vm0, %v464_v0  ;;  %v72_v4 = vpack.c.bf16 %v71_v3, %v70_v2  ;;  %v306_v7 = vld [vmem:[%s580_s2] ss:$0 sm:$0xff]  ;;  %vm347_vm3 = vmpackc.low %vm159_vm2, %vm159_vm2  ;;  %s467_s21 = smov [#allocation9]   ;;  %vm288_vm4 = vcmask 122880  }
  0x3a   :  { %325 = vmatpush3.bf16.msra.mxu0 %v360_v1  ;;  %331 = vmatpush3.bf16.msra.mxu1 %v361_v5  ;;  %v309_v18 = vld [vmem:[%s582_s4] ss:$0 sm:$0xff]  ;;  %s296_s22 = sshll.u32 %s467_s21, 4  ;;  %s297_s22 = int_to_ptr.vmem [resolvable:$true] %s296_s22 }
  0x3b   :  { %332 = vmatprep.subr.bf16.mxu1 %v464_v0  ;;  %345 = vmatprep.subr.bf16.mxu0 %v466_v17  ;;  %v206_v28 = vld [vmem:[%s583_s5] sm:$0x1]  ;;  %s429_s23 = scalar_lea.vmem %s297_s22, 16  ;;  %s433_s24 = scalar_lea.vmem %s297_s22, 32 }
  0x3c   :  { %p430_p10 = scmp.ne.s32.totalorder %s297_s22, %s429_s23  ;;  %p434_p11 = scmp.lt.s32.totalorder %s297_s22, %s297_s22 }
  0x3d   :  { %327 = vmatmul.mubr.msk.bf16.vlgmr.msra.gmra.mrb[0].mxu0 %vm88_vm1, %v72_v4  ;;  %p435_p12 = scmp.lt.s32.totalorder %s433_s24, %s429_s23 }
  0x3e   :  { %342 = vmatprep.mubr.msk.f32.mxu0 %vm465_vm0, %v464_v0  ;;  %333 = vmatpush3.bf16.msra.mxu1 %v362_v6 }
  0x3f   :  { %p436_p13 = por %p435_p12, %p434_p11 }
  0x41   :  { %p437_p0 = pnand %p436_p13, %p430_p10 }
 0x110   :  { %v126_v8 = vpop.f32.mrb[0].mxu0 }
 0x111   :  { %v127_v9 = vadd.f32 %v306_v7, %v126_v8  ;;  %v328_v10 = vpop.f32.mrb[1].mxu0 }
 0x112   :  { %v129_v11 = vpop.f32.mrb[2].mxu0 }
 0x113   :  { %v130_v12 = vadd.f32 %v306_v7, %v129_v11  ;;  %v329_v13 = vpop.f32.mrb[3].mxu0  ;;  %v133_v14 = vmax.f32 %v127_v9, 0.0 }
 0x115   :  { %v134_v15 = vmax.f32 %v130_v12, 0.0 }
 0x117   :  { %v135_v16 = vpack.c.bf16 %v134_v15, %v133_v14 }
 0x119   :  { %335 = vmatmul.mubr.msk.bf16.vlgmr.msra.gmra.mrb[0].mxu1 %vm159_vm2, %v135_v16 }
 0x1ec   :  { %v197_v19 = vpop.f32.mrb[0].mxu1 }
 0x1ed   :  { %v198_v20 = vadd.f32 %v309_v18, %v197_v19  ;;  %v336_v21 = vpop.f32.mrb[1].mxu1 }
 0x1ee   :  { %v200_v22 = vpop.f32.mrb[2].mxu1 }
 0x1ef   :  { %v201_v23 = vadd.f32 %v309_v18, %v200_v22  ;;  %v337_v24 = vpop.f32.mrb[3].mxu1  ;;  %v204_v25 = vmax.f32 %v198_v20, 0.0 }
 0x1f1   :  { %v205_v26 = vmax.f32 %v201_v23, 0.0 }
 0x1f3   :  { %v346_v27 = vpack.c.bf16 %v205_v26, %v204_v25 }
 0x1f5   :  { %348 = vmatpush3.bf16.xpose.msk.msra.mxu0 %vm347_vm3, %v346_v27 }
 0x1fc   :  { %343 = vmatmul.mubr.msk.f32.vlgmr.msra.gmra.mrb[4].mxu0 %vm159_vm2, %v206_v28 }
 0x2cf   :  { %v284_v30 = vpop.f32.mrb[4].mxu0 }
 0x2d0   :  { %v285_v31 = vadd.f32 %v284_v30, %v208_v29  ;;  %v344_v32 = vpop.f32.mrb[5].mxu0 }
 0x2d2   :  { %289 = vst.msk [vmem:[#allocation9] sm:$0x1] %vm288_vm4, %v285_v31 }
 0x2d3   :  { %440 = shalt.err (!%p437_p0)
}
 0x2d4   :  { %s441_s6 = scalar_lea.hbm %s585_s7, 16 }
 0x2d5   :  { %p442_p1 = scmp.ne.s32.totalorder %s585_s7, %s441_s6  ;;  %p445_p2 = scmp.lt.u32.totalorder %s441_s6, %s585_s7 }
 0x2d7   :  { %p447_p3 = pnand %p445_p2, %p442_p1 }
 0x2d9   :  { %450 = shalt.err (!%p447_p3)
}
 0x2da   :  { %299 = dma.vmem_to_hbm [thread:$0]  %s297_s22, 16, %s585_s7, [#allocation5]  }
 0x2db   :  { %455 = dma.done.wait [#allocation5], 16  }
 0x2dc   :  { %456 = vsyncadd [#allocation5], 4294967280 }
 0x2dd   :  { %303 = vsyncpa [#allocation4], 1 }
 0x2de   :  { %304 = vsyncpa [#allocation7], 1 }
 0x2df   :  { %305 = vsyncpa [#allocation5], 1 }

// kernel: tpu_custom_call.1
= control target key start
LH: loop header
LB: loop body
LE: loop exit
PB: predicated region body
PF: predicated region fallthrough
CT: control target
= control target key end

     0   :  { %13 = vsyncpa [#allocation4], 0  ;;  %s578_s0 = inlined_call_operand.hbm [shape: f32[16,16], index: 0, kind: input, shape index: {}]   ;;  %s579_s1 = inlined_call_operand.hbm [shape: bf16[16,32], index: 1, kind: input, shape index: {}]   ;;  %s580_s2 = inlined_call_operand.vmem [shape: f32[1,32], index: 2, kind: input, shape index: {}]   ;;  %s581_s3 = inlined_call_operand.hbm [shape: bf16[32,32], index: 3, kind: input, shape index: {}]   ;;  %s582_s4 = inlined_call_operand.vmem [shape: f32[1,32], index: 4, kind: input, shape index: {}]   ;;  %s583_s5 = inlined_call_operand.vmem [shape: f32[1,32], index: 5, kind: input, shape index: {}]   ;;  %s584_s6 = inlined_call_operand.<no memory space> [shape: f32[1,1], index: 6, kind: input, shape index: {}]   ;;  %s585_s7 = inlined_call_operand.hbm [shape: f32[1,1,16], index: 7, kind: output, shape index: {}]  }
   0x1   :  { %14 = vsyncpa [#allocation7], 0 }
   0x2   :  { %15 = vsyncpa [#allocation5], 0  ;;  %s457_s24 = smov [#allocation6]   ;;  %s363_s28 = scalar_lea.hbm %s579_s1, 128 }
   0x3   :  { %s33_s25 = sshll.u32 %s457_s24, 4  ;;  %p364_p0 = scmp.ne.s32.totalorder %s579_s1, %s363_s28  ;;  %s34_s25 = int_to_ptr.vmem [resolvable:$true] %s33_s25 }
   0x4   :  { %p367_p1 = scmp.lt.u32.totalorder %s363_s28, %s579_s1 }
   0x6   :  { %p369_p2 = pnand %p367_p1, %p364_p0 }
   0x8   :  { %372 = shalt.err (!%p369_p2)
}
   0x9   :  { %s373_s10 = scalar_lea.vmem %s34_s25, 128  ;;  %p378_p4 = scmp.lt.s32.totalorder %s34_s25, %s34_s25 }
   0xa   :  { %p374_p3 = scmp.ne.s32.totalorder %s34_s25, %s373_s10  ;;  %p379_p5 = scmp.lt.s32.totalorder %s373_s10, %s373_s10 }
   0xc   :  { %p380_p6 = por %p379_p5, %p378_p4 }
   0xe   :  { %p381_p7 = pnand %p380_p6, %p374_p3 }
  0x10   :  { %384 = shalt.err (!%p381_p7)
}
  0x11   :  { %s458_s11 = smov 64   ;;  %s459_s12 = smov 4  }
  0x12   :  { %39 = dma.hbm_to_vmem [thread:$0]  %s579_s1, 128, %s34_s25, [#allocation7], %s458_s11, %s458_s11, %s459_s12  }
  0x13   :  { %s460_s15 = smov [#allocation3]   ;;  %s385_s19 = scalar_lea.hbm %s578_s0, 256 }
  0x14   :  { %s21_s16 = sshll.u32 %s460_s15, 4  ;;  %p386_p8 = scmp.ne.s32.totalorder %s578_s0, %s385_s19  ;;  %s22_s16 = int_to_ptr.vmem [resolvable:$true] %s21_s16 }
  0x15   :  { %p389_p9 = scmp.lt.u32.totalorder %s385_s19, %s578_s0 }
  0x17   :  { %p391_p10 = pnand %p389_p9, %p386_p8 }
  0x19   :  { %394 = shalt.err (!%p391_p10)
}
  0x1a   :  { %s395_s24 = scalar_lea.vmem %s22_s16, 256  ;;  %p400_p12 = scmp.lt.s32.totalorder %s22_s16, %s22_s16 }
  0x1b   :  { %p396_p11 = scmp.ne.s32.totalorder %s22_s16, %s395_s24  ;;  %p401_p13 = scmp.lt.s32.totalorder %s395_s24, %s395_s24 }
  0x1d   :  { %p402_p0 = por %p401_p13, %p400_p12 }
  0x1f   :  { %p403_p1 = pnand %p402_p0, %p396_p11 }
  0x21   :  { %406 = shalt.err (!%p403_p1)
}
  0x22   :  { %s461_s1 = smov 128   ;;  %s462_s25 = smov 8  }
  0x23   :  { %27 = dma.hbm_to_vmem [thread:$0]  %s578_s0, 256, %s22_s16, [#allocation4], %s461_s1, %s461_s1, %s462_s25  }
  0x24   :  { %s463_s28 = smov [#allocation8]   ;;  %s407_s9 = scalar_lea.hbm %s581_s3, 256 }
  0x25   :  { %s47_s29 = sshll.u32 %s463_s28, 4  ;;  %p408_p2 = scmp.ne.s32.totalorder %s581_s3, %s407_s9  ;;  %s48_s29 = int_to_ptr.vmem [resolvable:$true] %s47_s29 }
  0x26   :  { %p411_p3 = scmp.lt.u32.totalorder %s407_s9, %s581_s3 }
  0x28   :  { %p413_p4 = pnand %p411_p3, %p408_p2 }
  0x2a   :  { %416 = shalt.err (!%p413_p4)
}
  0x2b   :  { %s417_s17 = scalar_lea.vmem %s48_s29, 256  ;;  %p422_p6 = scmp.lt.s32.totalorder %s48_s29, %s48_s29 }
  0x2c   :  { %p418_p5 = scmp.ne.s32.totalorder %s48_s29, %s417_s17  ;;  %p423_p7 = scmp.lt.s32.totalorder %s417_s17, %s417_s17 }
  0x2e   :  { %p424_p8 = por %p423_p7, %p422_p6 }
  0x30   :  { %p425_p9 = pnand %p424_p8, %p418_p5 }
  0x32   :  { %428 = shalt.err (!%p425_p9)
}
  0x33   :  { %53 = dma.hbm_to_vmem [thread:$0]  %s581_s3, 256, %s48_s29, [#allocation7], %s458_s11, %s458_s11, %s459_s12  }
  0x34   :  { %451 = dma.done.wait [#allocation4], 256  }
  0x35   :  { %452 = vsyncadd [#allocation4], 4294967040 }
  0x36   :  { %453 = dma.done.wait [#allocation7], 384  }
  0x37   :  { %454 = vsyncadd [#allocation7], 4294966912  ;;  %v464_v0 = vmov 0.0   ;;  %vm465_vm0 = vmmov 0   ;;  %v360_v1 = vld [vmem:[#allocation6] sm:$0xff]   ;;  %v70_v2 = vld [vmem:[#allocation3] sm:$0xff]  ;;  %v208_v29 = vstv %s584_s6 }
  0x38   :  { %324 = vmatprep.subr.bf16.mxu0 %v464_v0  ;;  %326 = vmatprep.mubr.msk.bf16.mxu0 %vm465_vm0, %v464_v0  ;;  %v71_v3 = vld [vmem:[#allocation3 + $0x8] sm:$0xff]  ;;  %vm88_vm1 = vcmask 130048   ;;  %v361_v5 = vld [vmem:[#allocation8] sm:$0xff]   ;;  %v362_v6 = vld [vmem:[#allocation8 + $0x8] sm:$0xff]   ;;  %vm159_vm2 = vcmask 261120   ;;  %v466_v17 = vmov 0.0|0.0  }
  0x39   :  { %330 = vmatprep.subr.bf16.mxu1 %v464_v0  ;;  %334 = vmatprep.mubr.msk.bf16.mxu1 %vm465_vm0, %v464_v0  ;;  %v72_v4 = vpack.c.bf16 %v71_v3, %v70_v2  ;;  %v306_v7 = vld [vmem:[%s580_s2] ss:$0 sm:$0xff]  ;;  %vm347_vm3 = vmpackc.low %vm159_vm2, %vm159_vm2  ;;  %s467_s21 = smov [#allocation9]   ;;  %vm288_vm4 = vcmask 122880  }
  0x3a   :  { %325 = vmatpush3.bf16.msra.mxu0 %v360_v1  ;;  %331 = vmatpush3.bf16.msra.mxu1 %v361_v5  ;;  %v309_v18 = vld [vmem:[%s582_s4] ss:$0 sm:$0xff]  ;;  %s296_s22 = sshll.u32 %s467_s21, 4  ;;  %s297_s22 = int_to_ptr.vmem [resolvable:$true] %s296_s22 }
  0x3b   :  { %332 = vmatprep.subr.bf16.mxu1 %v464_v0  ;;  %345 = vmatprep.subr.bf16.mxu0 %v466_v17  ;;  %v206_v28 = vld [vmem:[%s583_s5] sm:$0x1]  ;;  %s429_s23 = scalar_lea.vmem %s297_s22, 16  ;;  %s433_s24 = scalar_lea.vmem %s297_s22, 32 }
  0x3c   :  { %p430_p10 = scmp.ne.s32.totalorder %s297_s22, %s429_s23  ;;  %p434_p11 = scmp.lt.s32.totalorder %s297_s22, %s297_s22 }
  0x3d   :  { %327 = vmatmul.mubr.msk.bf16.vlgmr.msra.gmra.mrb[0].mxu0 %vm88_vm1, %v72_v4  ;;  %p435_p12 = scmp.lt.s32.totalorder %s433_s24, %s429_s23 }
  0x3e   :  { %342 = vmatprep.mubr.msk.f32.mxu0 %vm465_vm0, %v464_v0  ;;  %333 = vmatpush3.bf16.msra.mxu1 %v362_v6 }
  0x3f   :  { %p436_p13 = por %p435_p12, %p434_p11 }
  0x41   :  { %p437_p0 = pnand %p436_p13, %p430_p10 }
 0x110   :  { %v126_v8 = vpop.f32.mrb[0].mxu0 }
 0x111   :  { %v127_v9 = vadd.f32 %v306_v7, %v126_v8  ;;  %v328_v10 = vpop.f32.mrb[1].mxu0 }
 0x112   :  { %v129_v11 = vpop.f32.mrb[2].mxu0 }
 0x113   :  { %v130_v12 = vadd.f32 %v306_v7, %v129_v11  ;;  %v329_v13 = vpop.f32.mrb[3].mxu0  ;;  %v133_v14 = vmax.f32 %v127_v9, 0.0 }
 0x115   :  { %v134_v15 = vmax.f32 %v130_v12, 0.0 }
 0x117   :  { %v135_v16 = vpack.c.bf16 %v134_v15, %v133_v14 }
 0x119   :  { %335 = vmatmul.mubr.msk.bf16.vlgmr.msra.gmra.mrb[0].mxu1 %vm159_vm2, %v135_v16 }
 0x1ec   :  { %v197_v19 = vpop.f32.mrb[0].mxu1 }
 0x1ed   :  { %v198_v20 = vadd.f32 %v309_v18, %v197_v19  ;;  %v336_v21 = vpop.f32.mrb[1].mxu1 }
 0x1ee   :  { %v200_v22 = vpop.f32.mrb[2].mxu1 }
 0x1ef   :  { %v201_v23 = vadd.f32 %v309_v18, %v200_v22  ;;  %v337_v24 = vpop.f32.mrb[3].mxu1  ;;  %v204_v25 = vmax.f32 %v198_v20, 0.0 }
 0x1f1   :  { %v205_v26 = vmax.f32 %v201_v23, 0.0 }
 0x1f3   :  { %v346_v27 = vpack.c.bf16 %v205_v26, %v204_v25 }
 0x1f5   :  { %348 = vmatpush3.bf16.xpose.msk.msra.mxu0 %vm347_vm3, %v346_v27 }
 0x1fc   :  { %343 = vmatmul.mubr.msk.f32.vlgmr.msra.gmra.mrb[4].mxu0 %vm159_vm2, %v206_v28 }
 0x2cf   :  { %v284_v30 = vpop.f32.mrb[4].mxu0 }
 0x2d0   :  { %v285_v31 = vadd.f32 %v284_v30, %v208_v29  ;;  %v344_v32 = vpop.f32.mrb[5].mxu0 }
 0x2d2   :  { %289 = vst.msk [vmem:[#allocation9] sm:$0x1] %vm288_vm4, %v285_v31 }
 0x2d3   :  { %440 = shalt.err (!%p437_p0)
}
 0x2d4   :  { %s441_s6 = scalar_lea.hbm %s585_s7, 16 }
 0x2d5   :  { %p442_p1 = scmp.ne.s32.totalorder %s585_s7, %s441_s6  ;;  %p445_p2 = scmp.lt.u32.totalorder %s441_s6, %s585_s7 }
 0x2d7   :  { %p447_p3 = pnand %p445_p2, %p442_p1 }
 0x2d9   :  { %450 = shalt.err (!%p447_p3)
}
 0x2da   :  { %299 = dma.vmem_to_hbm [thread:$0]  %s297_s22, 16, %s585_s7, [#allocation5]  }
 0x2db   :  { %455 = dma.done.wait [#allocation5], 16  }
 0x2dc   :  { %456 = vsyncadd [#allocation5], 4294967280 }
 0x2dd   :  { %303 = vsyncpa [#allocation4], 1 }
 0x2de   :  { %304 = vsyncpa [#allocation7], 1 }
 0x2df   :  { %305 = vsyncpa [#allocation5], 1 }

</bundles_post_ra>
